<compile_context>
chip_gen: v6e
topology: v6e:2x2x1
jax: 0.10.0
libtpu: 0.0.40
codegen_flags: <defaults>
</compile_context>

<pallas_src>
import jax
import jax.numpy as jnp
from jax import lax
from jax.experimental import pallas as pl
from jax.experimental.pallas import tpu as pltpu


# ----------------------------------------------------------------------------
# Hardware-aware tiling constants
# ----------------------------------------------------------------------------
try:
    _VMEM_PHYS = int(pltpu.get_tpu_info().vmem_capacity_bytes)
except Exception:
    _VMEM_PHYS = 64 << 20  # conservative fallback = v7x (smallest physical VMEM)

_X_SLAB_TARGET = 8 << 20   # per-buffer x slab: measured 1-8 MiB DMA sweet spot


def _pick_b_tile(b, L, d, itemsize):
    """Budget-driven batch tile: fits VMEM, keeps DMA slabs in the sweet spot,
    and guarantees a multi-step grid for large-enough b."""
    budget = min(24 << 20, _VMEM_PHYS // 3)           # per-step total budget
    x_row = L * d * itemsize                          # x bytes per batch row
    row_bytes = itemsize * (L * d + 2 * L)            # x + mask + out per row

    bt_slab = max(8, _X_SLAB_TARGET // max(x_row, 1))
    bt_vmem = max(8, (budget - 2 * d * d * itemsize) // max(2 * row_bytes, 1))
    bt = min(bt_slab, bt_vmem)

    # Force >=2 steps (>=4 when b allows) so the v7x megacore can split the
    # batch axis and the double-buffered pipeline overlaps DMA with compute.
    if b >= 32:
        bt = min(bt, max(8, -(-b // 4)))
    elif b >= 16:
        bt = min(bt, max(8, -(-b // 2)))
    return int(max(1, min(bt, b)))


# ----------------------------------------------------------------------------
# Kernel
# ----------------------------------------------------------------------------
def self_attention_kernel(x_ref, mask_ref, M_ref, o_ref):
    """One grid step processes a (b_tile, L, d) slab of batch rows."""
    x = x_ref[...]        # (bt, L, d)
    msk = mask_ref[...]   # (bt, L)
    M = M_ref[...]        # (d, d), VMEM-resident (constant block index)

    # masked mean over the sequence axis -> y : (bt, d)
    sum_x = jnp.sum(x * msk[:, :, None], axis=1)                     # (bt, d)
    # exact reciprocal (approx rcp would exceed the 1e-5 test tolerance)
    inv_len = pl.reciprocal(jnp.sum(msk, axis=1, keepdims=True))     # (bt, 1)
    y = sum_x * inv_len                                              # (bt, d)

    # product_1 = M @ y per batch row:  p1[b, i] = sum_k M[i, k] * y[b, k]
    # (MXU matmul with N = b_tile instead of a per-row matvec)
    p1 = lax.dot_general(
        y, M, dimension_numbers=(((1,), (1,)), ((), ())),
        preferred_element_type=jnp.float32)                          # (bt, d)

    # product_2 = (x @ p1) * mask : (bt, L)   (lane-axis reduce over d)
    scores = jnp.sum(x * p1[:, None, :], axis=2) * msk               # (bt, L)

    # masked softmax over the sequence axis (mask applied before the max and
    # again after the exp, exactly as the PyTorch reference)
    mx = jnp.max(scores, axis=1, keepdims=True)                      # (bt, 1)
    e = jnp.exp(scores - mx) * msk                                   # (bt, L)
    inv_sum = pl.reciprocal(jnp.sum(e, axis=1, keepdims=True))       # (bt, 1)
    o_ref[...] = (e * inv_sum).astype(o_ref.dtype)


# ----------------------------------------------------------------------------
# Wrapper
# ----------------------------------------------------------------------------
def self_attention(x, mask, M, *, b_tile=None):
    """x: (b, L, d) f32, mask: (b, L) f32, M: (d, d) f32 -> (b, L) f32."""
    b, L, d = x.shape
    itemsize = jnp.dtype(x.dtype).itemsize

    if b_tile is None:
        b_tile = _pick_b_tile(b, L, d, itemsize)
    b_tile = max(1, min(int(b_tile), b))
    if b_tile < b:
        # mask/out blocks are (b_tile, L): the second-to-last block dim must be
        # a multiple of 8 sublanes unless it equals the full batch dim.
        b_tile = min(b, max(8, (b_tile // 8) * 8))
    n_steps = -(-b // b_tile)   # last block may be ragged; no host-side pad of x

    # Per-step VMEM footprint: double-buffered x/mask/out + double-buffered M.
    bytes_per_step = itemsize * (2 * b_tile * (L * d + 2 * L) + 2 * d * d)
    cp_kwargs = {}
    if bytes_per_step > (8 << 20):
        # ~30% headroom for compiler scratch / spilled temporaries; never exceed
        # physical VMEM minus headroom (v7x: 64 MiB physical, 32 MiB scoped default).
        cp_kwargs["vmem_limit_bytes"] = int(
            min(bytes_per_step + bytes_per_step // 4 + (2 << 20),
                max(_VMEM_PHYS - (16 << 20), 32 << 20)))

    cost = pl.CostEstimate(
        flops=int(b * (2 * d * d + 4 * L * d + 6 * L)),
        transcendentals=int(b * L),
        bytes_accessed=int(itemsize * (b * L * d + 2 * b * L + d * d)),
    )

    return pl.pallas_call(
        self_attention_kernel,
        out_shape=jax.ShapeDtypeStruct((b, L), x.dtype),
        grid_spec=pltpu.PrefetchScalarGridSpec(
            num_scalar_prefetch=0,
            grid=(n_steps,),
            in_specs=[
                pl.BlockSpec((b_tile, L, d), lambda i: (i, 0, 0)),  # x, streamed once
                pl.BlockSpec((b_tile, L), lambda i: (i, 0)),        # mask
                pl.BlockSpec((d, d), lambda i: (0, 0)),             # M (constant block -> resident)
            ],
            out_specs=pl.BlockSpec((b_tile, L), lambda i: (i, 0)),
        ),
        compiler_params=pltpu.CompilerParams(
            dimension_semantics=("parallel",), **cp_kwargs),
        cost_estimate=cost,
    )(x, mask, M)


def self_attention_ref(x, mask, M):
    """Pure-JAX reference mirroring the PyTorch forward exactly."""
    y = jnp.sum(x * mask[:, :, None], axis=1) / jnp.sum(mask, axis=1, keepdims=True)
    p1 = y @ M.T                                           # (b, d)
    p2 = jnp.sum(x * p1[:, None, :], axis=2) * mask        # (b, L)
    p2 = jnp.exp(p2 - jnp.max(p2, axis=1, keepdims=True)) * mask
    return p2 / jnp.sum(p2, axis=1, keepdims=True)


if __name__ == "__main__":
    key = jax.random.PRNGKey(0)
    kx, km, kx2 = jax.random.split(key, 3)

    # --- primary test: small shapes, single grid step -------------------------
    b, L, d = 2, 16, 32
    x = jax.random.normal(kx, (b, L, d), dtype=jnp.float32)

    # xavier_uniform_ init for M: U(-a, a), a = sqrt(6 / (fan_in + fan_out))
    a = (6.0 / (d + d)) ** 0.5
    M = jax.random.uniform(km, (d, d), dtype=jnp.float32, minval=-a, maxval=a)

    lengths = jnp.array([10, 16], dtype=jnp.int32)
    mask = (jnp.arange(L)[None, :] < lengths[:, None]).astype(jnp.float32)

    out = self_attention(x, mask, M)
    jax.block_until_ready(out)
    ref = self_attention_ref(x, mask, M)
    assert out.shape == (b, L)
    assert jnp.allclose(out, ref, atol=1e-5, rtol=1e-5), "mismatch vs reference (small)"

    # --- secondary test: multi-step grid with a ragged last block -------------
    b2 = 20
    x2 = jax.random.normal(kx2, (b2, L, d), dtype=jnp.float32)
    lengths2 = (jnp.arange(b2, dtype=jnp.int32) % L) + 1
    mask2 = (jnp.arange(L)[None, :] < lengths2[:, None]).astype(jnp.float32)

    out2 = self_attention(x2, mask2, M)          # auto tile -> b_tile=8, 3 steps, ragged tail
    jax.block_until_ready(out2)
    ref2 = self_attention_ref(x2, mask2, M)
    assert out2.shape == (b2, L)
    assert jnp.allclose(out2, ref2, atol=1e-5, rtol=1e-5), "mismatch vs reference (tiled/ragged)"

    print("KERNEL_OK")
</pallas_src>

<mosaic_0001>
module attributes {stable_mosaic.version = 11 : i64} {
  func.func @self_attention_kernel(%arg0: i32, %arg1: memref<2x16x32xf32, #tpu.memory_space<vmem>>, %arg2: memref<2x16xf32, #tpu.memory_space<vmem>>, %arg3: memref<32x32xf32, #tpu.memory_space<vmem>>, %arg4: memref<2x16xf32, #tpu.memory_space<vmem>>) attributes {dimension_semantics = [#tpu.dimension_semantics<parallel>], iteration_bounds = array<i64: 1>, scalar_prefetch = 0 : i64, scratch_operands = 0 : i64, tpu.core_type = #tpu.core_type<tc>, window_params = [{transform_indices = @transform_0, window_bounds = array<i64: 2, 16, 32>}, {transform_indices = @transform_1, window_bounds = array<i64: 2, 16>}, {pipeline_mode = #tpu.pipeline_mode<synchronous>, transform_indices = @transform_2, window_bounds = array<i64: 32, 32>}, {transform_indices = @transform_3, window_bounds = array<i64: 2, 16>}]} {
    %c0 = arith.constant 0 : index
    %c0_0 = arith.constant 0 : index
    %c0_1 = arith.constant 0 : index
    %0 = vector.load %arg1[%c0, %c0_0, %c0_1] : memref<2x16x32xf32, #tpu.memory_space<vmem>>, vector<2x16x32xf32>
    %c0_2 = arith.constant 0 : index
    %c0_3 = arith.constant 0 : index
    %1 = vector.load %arg2[%c0_2, %c0_3] : memref<2x16xf32, #tpu.memory_space<vmem>>, vector<2x16xf32>
    %c0_4 = arith.constant 0 : index
    %c0_5 = arith.constant 0 : index
    %2 = vector.load %arg3[%c0_4, %c0_5] : memref<32x32xf32, #tpu.memory_space<vmem>>, vector<32x32xf32>
    %3 = vector.shape_cast %1 : vector<2x16xf32> to vector<2x16x1xf32>
    %4 = vector.broadcast %3 : vector<2x16x1xf32> to vector<2x16x32xf32>
    %5 = arith.mulf %0, %4 : vector<2x16x32xf32>
    %cst = arith.constant dense<0.000000e+00> : vector<2x32xf32>
    %6 = vector.multi_reduction <add>, %5, %cst [1] : vector<2x16x32xf32> to vector<2x32xf32>
    %cst_6 = arith.constant dense<0.000000e+00> : vector<2xf32>
    %7 = vector.multi_reduction <add>, %1, %cst_6 [1] : vector<2x16xf32> to vector<2xf32>
    %8 = vector.shape_cast %7 : vector<2xf32> to vector<2x1xf32>
    %9 = tpu.reciprocal %8 : vector<2x1xf32> -> vector<2x1xf32>
    %10 = vector.broadcast %9 : vector<2x1xf32> to vector<2x32xf32>
    %11 = arith.mulf %6, %10 : vector<2x32xf32>
    %cst_7 = arith.constant dense<0.000000e+00> : vector<2x32xf32>
    %12 = tpu.matmul %11, %2, %cst_7 {dimension_numbers = #tpu.dot_dimension_numbers<[1], [1], [0], [0], [0, 0, 1, 0], [], []>} : vector<2x32xf32>, vector<32x32xf32>, vector<2x32xf32> -> vector<2x32xf32>
    %13 = vector.shape_cast %12 : vector<2x32xf32> to vector<2x1x32xf32>
    %14 = vector.broadcast %13 : vector<2x1x32xf32> to vector<2x16x32xf32>
    %15 = arith.mulf %0, %14 : vector<2x16x32xf32>
    %cst_8 = arith.constant dense<0.000000e+00> : vector<2x16xf32>
    %16 = vector.multi_reduction <add>, %15, %cst_8 [2] : vector<2x16x32xf32> to vector<2x16xf32>
    %17 = arith.mulf %16, %1 : vector<2x16xf32>
    %cst_9 = arith.constant dense<0xFF800000> : vector<2xf32>
    %18 = vector.multi_reduction <maximumf>, %17, %cst_9 [1] : vector<2x16xf32> to vector<2xf32>
    %19 = vector.shape_cast %18 : vector<2xf32> to vector<2x1xf32>
    %20 = vector.broadcast %19 : vector<2x1xf32> to vector<2x16xf32>
    %21 = arith.subf %17, %20 : vector<2x16xf32>
    %22 = math.exp %21 : vector<2x16xf32>
    %23 = arith.mulf %22, %1 : vector<2x16xf32>
    %cst_10 = arith.constant dense<0.000000e+00> : vector<2xf32>
    %24 = vector.multi_reduction <add>, %23, %cst_10 [1] : vector<2x16xf32> to vector<2xf32>
    %25 = vector.shape_cast %24 : vector<2xf32> to vector<2x1xf32>
    %26 = tpu.reciprocal %25 : vector<2x1xf32> -> vector<2x1xf32>
    %27 = vector.broadcast %26 : vector<2x1xf32> to vector<2x16xf32>
    %28 = arith.mulf %23, %27 : vector<2x16xf32>
    %c0_11 = arith.constant 0 : index
    %c0_12 = arith.constant 0 : index
    %29 = vector.load %arg4[%c0_11, %c0_12] : memref<2x16xf32, #tpu.memory_space<vmem>>, vector<2x16xf32>
    tpu.vector_store %arg4[%c0_11, %c0_12], %28 {strides = array<i32>} : memref<2x16xf32, #tpu.memory_space<vmem>>, vector<2x16xf32>,
    return
  }
  func.func @transform_0(%arg0: i32) -> (i32, i32, i32) {
    %c0_i32 = arith.constant 0 : i32
    %c0_i32_0 = arith.constant 0 : i32
    %c0_i32_1 = arith.constant 0 : i32
    return %arg0, %c0_i32, %c0_i32_0 : i32, i32, i32
  }
  func.func @transform_1(%arg0: i32) -> (i32, i32) {
    %c0_i32 = arith.constant 0 : i32
    %c0_i32_0 = arith.constant 0 : i32
    return %arg0, %c0_i32 : i32, i32
  }
  func.func @transform_2(%arg0: i32) -> (i32, i32) {
    %c0_i32 = arith.constant 0 : i32
    %c0_i32_0 = arith.constant 0 : i32
    %c0_i32_1 = arith.constant 0 : i32
    return %c0_i32, %c0_i32_0 : i32, i32
  }
  func.func @transform_3(%arg0: i32) -> (i32, i32) {
    %c0_i32 = arith.constant 0 : i32
    %c0_i32_0 = arith.constant 0 : i32
    return %arg0, %c0_i32 : i32, i32
  }
}

</mosaic_0001>

<bundles_post_ra>
// kernel: tpu_custom_call.1
= control target key start
LH: loop header
LB: loop body
LE: loop exit
PB: predicated region body
PF: predicated region fallthrough
CT: control target
= control target key end

     0   :  { %8 = vsyncpa [#allocation3], 0  ;;  %s715_s0 = inlined_call_operand.hbm [shape: f32[2,16,32], index: 0, kind: input, shape index: {}]   ;;  %s716_s1 = inlined_call_operand.hbm [shape: f32[2,16], index: 1, kind: input, shape index: {}]   ;;  %s717_s2 = inlined_call_operand.hbm [shape: f32[32,32], index: 2, kind: input, shape index: {}]   ;;  %s718_s3 = inlined_call_operand.hbm [shape: f32[2,16], index: 3, kind: output, shape index: {}]  }
   0x1   :  { %9 = vsyncpa [#allocation6], 0 }
   0x2   :  { %10 = vsyncpa [#allocation4], 0  ;;  %s597_s12 = smov [#allocation5]   ;;  %s598_s14 = smov [#allocation2]  }
   0x3   :  { %s29_s13 = sshll.u32 %s597_s12, 4  ;;  %s16_s15 = sshll.u32 %s598_s14, 4  ;;  %s30_s13 = int_to_ptr.vmem [resolvable:$true] %s29_s13  ;;  %s17_s15 = int_to_ptr.vmem [resolvable:$true] %s16_s15 }
   0x4   :  { %s519_s16 = scalar_lea.vmem %s30_s13, 32  ;;  %p524_p1 = scmp.lt.s32.totalorder %s30_s13, %s30_s13 }
   0x5   :  { %p520_p0 = scmp.ne.s32.totalorder %s30_s13, %s519_s16  ;;  %p525_p2 = scmp.lt.s32.totalorder %s519_s16, %s519_s16 }
   0x7   :  { %p526_p3 = por %p525_p2, %p524_p1 }
   0x9   :  { %p527_p4 = pnand %p526_p3, %p520_p0 }
   0xb   :  { %530 = shalt.err (!%p527_p4)
}
   0xc   :  { %32 = dma.hbm_to_vmem [thread:$0]  %s716_s1, 32, %s30_s13, [#allocation6]  }
   0xd   :  { %s539_s19 = scalar_lea.vmem %s17_s15, 512  ;;  %p544_p6 = scmp.lt.s32.totalorder %s17_s15, %s17_s15 }
   0xe   :  { %p540_p5 = scmp.ne.s32.totalorder %s17_s15, %s539_s19  ;;  %p545_p7 = scmp.lt.s32.totalorder %s539_s19, %s539_s19 }
  0x10   :  { %p546_p8 = por %p545_p7, %p544_p6 }
  0x12   :  { %p547_p9 = pnand %p546_p8, %p540_p5 }
  0x14   :  { %550 = shalt.err (!%p547_p9)
}
  0x15   :  { %s599_s20 = smov 128   ;;  %s600_s21 = smov 8  }
  0x16   :  { %22 = dma.hbm_to_vmem [thread:$0]  %s715_s0, 512, %s17_s15, [#allocation3], %s599_s20, %s599_s20, %s600_s21  }
  0x17   :  { %s601_s24 = smov [#allocation7]  }
  0x18   :  { %s38_s25 = sshll.u32 %s601_s24, 4  ;;  %s39_s25 = int_to_ptr.vmem [resolvable:$true] %s38_s25 }
  0x19   :  { %s559_s26 = scalar_lea.vmem %s39_s25, 512  ;;  %p564_p11 = scmp.lt.s32.totalorder %s39_s25, %s39_s25 }
  0x1a   :  { %p560_p10 = scmp.ne.s32.totalorder %s39_s25, %s559_s26  ;;  %p565_p12 = scmp.lt.s32.totalorder %s559_s26, %s559_s26 }
  0x1c   :  { %p566_p13 = por %p565_p12, %p564_p11 }
  0x1e   :  { %p567_p0 = pnand %p566_p13, %p560_p10 }
  0x20   :  { %570 = shalt.err (!%p567_p0)
}
  0x21   :  { %44 = dma.hbm_to_vmem [thread:$0]  %s717_s2, 512, %s39_s25, [#allocation6], %s599_s20, %s599_s20, %s600_s21  }
  0x22   :  { %591 = dma.done.wait [#allocation3], 512  }
  0x23   :  { %592 = vsyncadd [#allocation3], 4294966784 }
  0x24   :  { %593 = dma.done.wait [#allocation6], 544  }
  0x25   :  { %594 = vsyncadd [#allocation6], 4294966752  ;;  %v63_v0 = vlaneseq  ;;  %vm108_vm0 = vcmask 123904   ;;  %v58_v4 = vld [vmem:[#allocation5] sm:$0x3]  ;;  %vm89_vm1 = vcmask 261120  }
  0x26   :  { %v109_v5 = vsel %vm108_vm0, %v58_v4, 0.0  ;;  %v602_v8 = vmov 0.0   ;;  %v62_v9 = vld [vmem:[#allocation7 + $0x18] sm:$0xff]  ;;  %v61_v10 = vld [vmem:[#allocation7 + $0x10] sm:$0xff]  ;;  %v60_v11 = vld [vmem:[#allocation7 + $0x8] sm:$0xff]  ;;  %vm603_vm2 = vmmov 0  }
  0x27   :  { %v637_v1 = vshrl.u32 %v63_v0, 7  ;;  %110 = vadd.xlane.f32.xlu0 %v109_v5  ;;  %476 = vmatprep.subr.mxu0 %v602_v8  ;;  %v59_v12 = vld [vmem:[#allocation7] sm:$0xff]  ;;  %v57_v23 = vld [vmem:[#allocation2 + $0x18] sm:$0xff]  ;;  %v56_v26 = vld [vmem:[#allocation2 + $0x10] sm:$0xff]  ;;  %vm122_vm3 = vcmask 1041409   ;;  %v605_v63 = vmov 0  }
  0x28   :  { %477 = vmatpush3.xpose.msk.msra.mxu0 %vm89_vm1, %v62_v9  ;;  %484 = vmatprep.mubr.msk.f32.mxu0 %vm603_vm2, %v602_v8  ;;  %v54_v15 = vld [vmem:[#allocation2] sm:$0xff]  ;;  %v55_v17 = vld [vmem:[#allocation2 + $0x8] sm:$0xff]  ;;  %v604_v50 = vmov 1966171168   ;;  %vm315_vm4 = vcmask 130112   ;;  %s606_s0 = smov [#allocation8]  }
  0x29   :  { %v640_v2 = vsub.s32 1, %v637_v1  ;;  %v643_v3 = vsub.s32 0, %v637_v1  ;;  %478 = vmatprep.subr.mxu0 %v602_v8  ;;  %v210_v51 = vunpack.c.l.s4 %v604_v50  ;;  %497 = vset.pattern.permute.xlu0 %v605_v63  ;;  %s456_s2 = sshll.u32 %s606_s0, 4  ;;  %s457_s2 = int_to_ptr.vmem [resolvable:$true] %s456_s2 }
  0x2a   :  { %498 = vset.pattern.permute.xlu1 %v605_v63  ;;  %s571_s28 = scalar_lea.vmem %s457_s2, 32  ;;  %p576_p2 = scmp.lt.s32.totalorder %s457_s2, %s457_s2 }
  0x2b   :  { %v647_v6 = vrot.slane %v58_v4, %v640_v2  ;;  %v650_v7 = vrot.slane %v58_v4, %v643_v3  ;;  %v211_v52 = vunpack.c.0.s8 %v210_v51  ;;  %p572_p1 = scmp.ne.s32.totalorder %s457_s2, %s571_s28  ;;  %p577_p3 = scmp.lt.s32.totalorder %s571_s28, %s571_s28 }
  0x2c   :  { %479 = vmatpush3.xpose.msk.msra.mxu0 %vm89_vm1, %v61_v10 }
  0x2d   :  { %83 = vbcast.lane.b32.xlu1 %v647_v6, 264  ;;  %480 = vmatprep.subr.mxu0 %v602_v8  ;;  %v214_v53 = vsub.s32 %v211_v52, %v637_v1  ;;  %p578_p4 = por %p577_p3, %p576_p2 }
  0x2f   :  { %p579_p5 = pnand %p578_p4, %p572_p1 }
  0x30   :  { %481 = vmatpush3.xpose.msk.msra.mxu0 %vm89_vm1, %v60_v11 }
  0x31   :  { %68 = vbcast.lane.b32.xlu1 %v650_v7, 256  ;;  %482 = vmatprep.subr.mxu0 %v602_v8 }
  0x34   :  { %483 = vmatpush3.xpose.msk.msra.mxu0 %vm89_vm1, %v59_v12 }
  0x35   :  { %72 = vbcast.lane.b32.xlu1 %v650_v7, 264 }
  0x39   :  { %263 = vbcast.lane.b32.xlu1 %v650_v7, 256 }
  0x3d   :  { %79 = vbcast.lane.b32.xlu0 %v647_v6, 256 }
  0x9f   :  { %v84_v13 = vpop.permute.xlu1 %83 }
  0xa0   :  { %v88_v27 = vmul.f32 %v84_v13, %v57_v23 }
  0xa2   :  { %v100_v31 = vsel %vm89_vm1, %v88_v27, 0.0 }
  0xa3   :  { %v69_v14 = vpop.permute.xlu1 %68 }
  0xa4   :  { %v85_v18 = vmul.f32 %v69_v14, %v54_v15 }
  0xa6   :  { %v90_v20 = vsel %vm89_vm1, %v85_v18, 0.0 }
  0xa7   :  { %v73_v16 = vpop.permute.xlu1 %72 }
  0xa8   :  { %v86_v19 = vmul.f32 %v73_v16, %v55_v17 }
  0xaa   :  { %v91_v21 = vsel %vm89_vm1, %v86_v19, 0.0 }
  0xab   :  { %v92_v22 = vadd.f32 %v91_v21, %v90_v20  ;;  %v264_v13 = vpop.permute.xlu1 %263 }
  0xad   :  { %v93_v24 = vrot.slane %v92_v22, 4 }
  0xaf   :  { %v94_v28 = vadd.f32 %v93_v24, %v92_v22  ;;  %v305_v24 = vand.u32 127, %v63_v0 }
  0xb0   :  { %v111_v25 = vpop.xlane.xlu0 %110 }
  0xb1   :  { %499 = vrcp.f32 %v111_v25  ;;  %v95_v33 = vrot.slane %v94_v28, 2  ;;  %v310_v25 = vadd.s32 4294967288, %v305_v24 }
  0xb3   :  { %v96_v36 = vadd.f32 %v95_v33, %v94_v28  ;;  %v682_v28 = vsub.s32 %v305_v24, %v637_v1 }
  0xb4   :  { %v80_v29 = vpop.permute.xlu0 %79 }
  0xb5   :  { %v87_v30 = vmul.f32 %v80_v29, %v56_v26  ;;  %v97_v39 = vrot.slane %v96_v36, 1 }
  0xb7   :  { %v99_v32 = vsel %vm89_vm1, %v87_v30, 0.0  ;;  %v98_v43 = vadd.f32 %v97_v39, %v96_v36 }
  0xb8   :  { %v101_v34 = vadd.f32 %v100_v31, %v99_v32 }
  0xba   :  { %v102_v35 = vrot.slane %v101_v34, 4 }
  0xbc   :  { %v103_v37 = vadd.f32 %v102_v35, %v101_v34 }
  0xbe   :  { %v104_v38 = vrot.slane %v103_v37, 2  ;;  %v500_v41 = vpop.eup %499 }
  0xbf   :  { %v114_v45 = vrot.slane %v500_v41, 1  ;;  %v117_v47 = vmul.f32 %v500_v41, %v98_v43 }
  0xc0   :  { %v105_v40 = vadd.f32 %v104_v38, %v103_v37 }
  0xc2   :  { %v106_v42 = vrot.slane %v105_v40, 1 }
  0xc4   :  { %v107_v44 = vadd.f32 %v106_v42, %v105_v40 }
  0xc6   :  { %v118_v46 = vmul.f32 %v114_v45, %v107_v44 }
  0xc8   :  { %v121_v48 = vrot.slane %v118_v46, 7 }
  0xca   :  { %v123_v49 = vsel %vm122_vm3, %v121_v48, %v117_v47 }
  0xcb   :  { %485 = vmatmul.mubr.msk.f32.vlgmr.msra.gmra.mxu0 %vm89_vm1, %v123_v49 }
 0x18b   :  { %v204_v54 = vpop.f32.mrf.mxu0 }
 0x18c   :  { %v215_v55 = vrot.slane %v204_v54, %v214_v53 }
 0x18d   :  { %v486_v56 = vpop.f32.mrf.mxu0 }
 0x18e   :  { %v223_v57 = vrot.slane %v215_v55, %v214_v53  ;;  %v216_v4 = vcombine.high %v215_v55, %v215_v55 }
 0x190   :  { %v234_v58 = vrot.slane %v223_v57, %v643_v3  ;;  %v230_v5 = vrot.slane %v216_v4, %v214_v53 }
 0x192   :  { %v242_v59 = vmul.f32 %v234_v58, %v55_v17  ;;  %v241_v60 = vmul.f32 %v234_v58, %v54_v15  ;;  %v238_v8 = vrot.slane %v230_v5, %v643_v3 }
 0x194   :  { %v248_v61 = vsel %vm89_vm1, %v242_v59, 0.0  ;;  %v245_v62 = vsel %vm89_vm1, %v241_v60, 0.0  ;;  %v243_v9 = vmul.f32 %v238_v8, %v56_v26  ;;  %v244_v11 = vmul.f32 %v238_v8, %v57_v23 }
 0x195   :  { %249 = vadd.xlane.f32.xlu0 %v248_v61  ;;  %246 = vadd.xlane.f32.xlu1 %v245_v62  ;;  %v679_v26 = vsub.s32 %v310_v25, %v637_v1 }
 0x196   :  { %v251_v10 = vsel %vm89_vm1, %v243_v9, 0.0  ;;  %v254_v12 = vsel %vm89_vm1, %v244_v11, 0.0 }
 0x1a6   :  { %274 = vbcast.lane.b32.xlu1 %v647_v6, 256 }
 0x1ab   :  { %267 = vbcast.lane.b32.xlu0 %v650_v7, 264 }
 0x1ca   :  { %252 = vadd.xlane.f32.xlu1 %v251_v10 }
 0x1ce   :  { %255 = vadd.xlane.f32.xlu1 %v254_v12 }
 0x1df   :  { %278 = vbcast.lane.b32.xlu1 %v647_v6, 264 }
 0x21e   :  { %v250_v14 = vpop.xlane.xlu0 %249  ;;  %v247_v15 = vpop.xlane.xlu1 %246 }
 0x21f   :  { %v284_v16 = vmul.f32 %v264_v13, %v247_v15 }
 0x221   :  { %293 = vperm.xlu0 %497, %v284_v16  }
 0x222   :  { %v268_v7 = vpop.permute.xlu0 %267  ;;  %v275_v18 = vpop.permute.xlu1 %274 }
 0x223   :  { %v285_v17 = vmul.f32 %v268_v7, %v250_v14 }
 0x225   :  { %296 = vperm.xlu1 %498, %v285_v17  }
 0x253   :  { %v253_v19 = vpop.xlane.xlu1 %252 }
 0x254   :  { %v286_v20 = vmul.f32 %v275_v18, %v253_v19 }
 0x256   :  { %299 = vperm.xlu1 %498, %v286_v20  }
 0x257   :  { %v256_v21 = vpop.xlane.xlu1 %255 }
 0x25b   :  { %v279_v22 = vpop.permute.xlu1 %278 }
 0x25c   :  { %v287_v23 = vmul.f32 %v279_v22, %v256_v21 }
 0x25e   :  { %302 = vperm.xlu0 %497, %v287_v23  }
 0x29c   :  { %v294_v27 = vpop.permute.xlu0 %293 }
 0x29d   :  { %v309_v32 = vrot.slane %v294_v27, %v682_v28 }
 0x2a0   :  { %v297_v6 = vpop.permute.xlu1 %296 }
 0x2a1   :  { %v314_v30 = vrot.slane %v297_v6, %v679_v26 }
 0x2a3   :  { %v316_v34 = vsel %vm315_vm4, %v314_v30, %v309_v32 }
 0x2d1   :  { %v300_v29 = vpop.permute.xlu1 %299 }
 0x2d2   :  { %v320_v33 = vrot.slane %v300_v29, %v682_v28 }
 0x2d9   :  { %v303_v31 = vpop.permute.xlu0 %302 }
 0x2da   :  { %v324_v0 = vrot.slane %v303_v31, %v679_v26 }
 0x2dc   :  { %v325_v35 = vsel %vm315_vm4, %v324_v0, %v320_v33 }
 0x2dd   :  { %v326_v36 = vsel %vm122_vm3, %v325_v35, %v316_v34 }
 0x2de   :  { %v328_v1 = vsel %vm108_vm0, %v326_v36, -inf }
 0x2df   :  { %329 = vmax.xlane.f32.xlu1 %v328_v1 }
 0x368   :  { %v330_v37 = vpop.xlane.xlu1 %329 }
 0x369   :  { %v335_v38 = vrot.slane %v330_v37, %v643_v3  ;;  %v339_v39 = vrot.slane %v330_v37, %v640_v2 }
 0x36b   :  { %v342_v40 = vsub.f32 %v284_v16, %v335_v38  ;;  %v343_v41 = vsub.f32 %v285_v17, %v335_v38  ;;  %v344_v42 = vsub.f32 %v286_v20, %v339_v39  ;;  %v345_v45 = vsub.f32 %v287_v23, %v339_v39 }
 0x36d   :  { %v346_v43 = vmul.f32 1.442695, %v342_v40  ;;  %v348_v44 = vmul.f32 1.442695, %v343_v41  ;;  %v350_v46 = vmul.f32 1.442695, %v344_v42 }
 0x36e   :  { %v352_v47 = vmul.f32 1.442695, %v345_v45 }
 0x36f   :  { %501 = vpow2.f32 %v346_v43 }
 0x370   :  { %503 = vpow2.f32 %v348_v44 }
 0x371   :  { %505 = vpow2.f32 %v350_v46 }
 0x372   :  { %507 = vpow2.f32 %v352_v47 }
 0x37c   :  { %v502_v48 = vpop.eup %501 }
 0x37d   :  { %v354_v49 = vmul.f32 %v502_v48, %v264_v13  ;;  %v504_v50 = vpop.eup %503 }
 0x37e   :  { %v355_v51 = vmul.f32 %v504_v50, %v268_v7  ;;  %v506_v52 = vpop.eup %505 }
 0x37f   :  { %363 = vperm.xlu0 %497, %v354_v49   ;;  %v356_v53 = vmul.f32 %v506_v52, %v275_v18  ;;  %v508_v54 = vpop.eup %507 }
 0x380   :  { %v357_v55 = vmul.f32 %v508_v54, %v279_v22 }
 0x383   :  { %366 = vperm.xlu0 %497, %v355_v51  }
 0x387   :  { %369 = vperm.xlu0 %497, %v356_v53  }
 0x38b   :  { %372 = vperm.xlu0 %497, %v357_v55  }
 0x3fa   :  { %v364_v56 = vpop.permute.xlu0 %363 }
 0x3fb   :  { %v377_v61 = vrot.slane %v364_v56, %v682_v28 }
 0x3fe   :  { %v367_v57 = vpop.permute.xlu0 %366 }
 0x3ff   :  { %v381_v59 = vrot.slane %v367_v57, %v679_v26 }
 0x401   :  { %v382_v4 = vsel %vm315_vm4, %v381_v59, %v377_v61 }
 0x402   :  { %v370_v58 = vpop.permute.xlu0 %369 }
 0x403   :  { %v386_v62 = vrot.slane %v370_v58, %v682_v28 }
 0x406   :  { %v373_v60 = vpop.permute.xlu0 %372 }
 0x407   :  { %v390_v63 = vrot.slane %v373_v60, %v679_v26 }
 0x409   :  { %v391_v5 = vsel %vm315_vm4, %v390_v63, %v386_v62 }
 0x40a   :  { %v392_v8 = vsel %vm122_vm3, %v391_v5, %v382_v4 }
 0x40b   :  { %v394_v9 = vsel %vm108_vm0, %v392_v8, 0.0 }
 0x40c   :  { %395 = vadd.xlane.f32.xlu0 %v394_v9 }
 0x495   :  { %v396_v10 = vpop.xlane.xlu0 %395 }
 0x496   :  { %509 = vrcp.f32 %v396_v10 }
 0x4a3   :  { %v510_v11 = vpop.eup %509 }
 0x4a4   :  { %v402_v12 = vrot.slane %v510_v11, %v643_v3  ;;  %v406_v15 = vrot.slane %v510_v11, %v640_v2 }
 0x4a6   :  { %v410_v13 = vmul.f32 %v402_v12, %v355_v51  ;;  %v409_v14 = vmul.f32 %v402_v12, %v354_v49  ;;  %v411_v16 = vmul.f32 %v406_v15, %v356_v53  ;;  %v412_v7 = vmul.f32 %v406_v15, %v357_v55 }
 0x4a8   :  { %421 = vperm.xlu0 %497, %v410_v13   ;;  %418 = vperm.xlu1 %498, %v409_v14  }
 0x4ac   :  { %424 = vperm.xlu1 %498, %v411_v16  }
 0x4b0   :  { %427 = vperm.xlu1 %498, %v412_v7  }
 0x523   :  { %v419_v17 = vpop.permute.xlu1 %418  ;;  %v422_v18 = vpop.permute.xlu0 %421 }
 0x524   :  { %v436_v20 = vrot.slane %v422_v18, %v679_v26  ;;  %v432_v21 = vrot.slane %v419_v17, %v682_v28 }
 0x526   :  { %v437_v23 = vsel %vm315_vm4, %v436_v20, %v432_v21 }
 0x527   :  { %v425_v19 = vpop.permute.xlu1 %424 }
 0x528   :  { %v441_v3 = vrot.slane %v425_v19, %v682_v28 }
 0x52b   :  { %v428_v22 = vpop.permute.xlu1 %427 }
 0x52c   :  { %v445_v2 = vrot.slane %v428_v22, %v679_v26 }
 0x52e   :  { %v446_v24 = vsel %vm315_vm4, %v445_v2, %v441_v3 }
 0x52f   :  { %v447_v25 = vsel %vm122_vm3, %v446_v24, %v437_v23 }
 0x530   :  { %449 = vst.msk [vmem:[#allocation8] sm:$0x3] %vm108_vm0, %v447_v25 }
 0x531   :  { %582 = shalt.err (!%p579_p5)
}
 0x532   :  { %459 = dma.vmem_to_hbm [thread:$0]  %s457_s2, 32, %s718_s3, [#allocation4]  }
 0x533   :  { %595 = dma.done.wait [#allocation4], 32  }
 0x534   :  { %596 = vsyncadd [#allocation4], 4294967264 }
 0x535   :  { %463 = vsyncpa [#allocation3], 1 }
 0x536   :  { %464 = vsyncpa [#allocation6], 1 }
 0x537   :  { %465 = vsyncpa [#allocation4], 1 }

</bundles_post_ra>
